<compile_context>
chip_gen: v7x
topology: tpu7x:2x2x1
jax: 0.10.0
libtpu: 0.0.40
codegen_flags: <defaults>
</compile_context>

<pallas_src>
import jax
import jax.numpy as jnp
import numpy as np
from jax.experimental import pallas as pl
from jax.experimental.pallas import tpu as pltpu


_LANE = 128
_SUBLANE = 8


def _cdiv(a, b):
    return -(-a // b)


def _round_up(x, m):
    return _cdiv(x, m) * m


def _sublane_multiple(dtype):
    # Sub-32-bit dtypes pack along sublanes: 8 rows for f32, 16 for bf16,
    # 32 for int8/fp8.
    return max(_SUBLANE, 32 // jnp.dtype(dtype).itemsize)


def _padded_block_bytes(shape, dtype):
    """VMEM footprint of one block ((sublane, 128)-padded last two dims)."""
    s = list(shape)
    if len(s) >= 2:
        s[-2] = _round_up(s[-2], _sublane_multiple(dtype))
    s[-1] = _round_up(s[-1], _LANE)
    n = 1
    for d in s:
        n *= d
    return n * jnp.dtype(dtype).itemsize


def _pick_lane_tile(total, max_tile):
    """Tile for the last (lane) dim: the full extent, or a multiple of 128."""
    max_tile = max(_LANE, (max_tile // _LANE) * _LANE)
    if total <= max_tile:
        return total          # full extent is always a legal block dim
    return max_tile           # multiple of 128; remainder masked / dropped


# ----------------------------------------------------------------------------
# Stage 1: pipelined global average pool over the spatial axis (2-D blocks).
# ----------------------------------------------------------------------------
def _make_pool_mean_kernel(hw, hw_tile):
    need_mask = (hw % hw_tile) != 0
    inv_hw = 1.0 / float(hw)

    def kernel(x_ref, pooled_ref):
        # x_ref:      (r_tile, hw_tile)
        # pooled_ref: (r_tile, 1) f32 -- resident across the reduction axis,
        #             used directly as the accumulator (no extra scratch).
        t = pl.program_id(1)
        last = pl.num_programs(1) - 1

        @pl.when(t == 0)
        def _():
            pooled_ref[...] = jnp.zeros_like(pooled_ref)

        if need_mask:
            # Only the final spatial tile runs past the array: keep the
            # iota/compare/where off the hot path of every other tile so the
            # stage stays HBM-bound (not VALU-bound) on v7x.
            @pl.when(t < last)
            def _():
                x = x_ref[...].astype(jnp.float32)
                pooled_ref[...] += jnp.sum(x, axis=-1, keepdims=True)

            @pl.when(t == last)
            def _():
                x = x_ref[...].astype(jnp.float32)
                lane = (jax.lax.broadcasted_iota(jnp.int32, x.shape, 1)
                        + t * hw_tile)
                x = jnp.where(lane < hw, x, 0.0)   # zero out-of-range lanes
                pooled_ref[...] += jnp.sum(x, axis=-1, keepdims=True)
        else:
            x = x_ref[...].astype(jnp.float32)
            pooled_ref[...] += jnp.sum(x, axis=-1, keepdims=True)

        @pl.when(t == last)
        def _():
            pooled_ref[...] *= inv_hw

    return kernel


def _global_avg_pool(x2d, *, r_tile_max=512, hw_tile_max=2048,
                     vmem_budget=16 * 2**20):
    """x2d: (N*C_in, HW) -> (N*C_in, 1) f32 spatial mean."""
    R, HW = x2d.shape
    itemsize = jnp.dtype(x2d.dtype).itemsize

    # Row tile: a multiple of 8 (sublane) or the full extent; aim for >= 2 row
    # blocks so both v7x TensorCores get work on the "parallel" axis.
    if R <= _SUBLANE:
        r_tile = R
    else:
        r_tile = min(r_tile_max, _round_up(_cdiv(R, 2), _SUBLANE))

    # Spatial tile: largest multiple of 128 whose *double-buffered* block fits
    # the VMEM budget (512-2048 lanes ~ 85% of the HBM roofline).
    row_bytes = _round_up(r_tile, _sublane_multiple(x2d.dtype)) * itemsize
    max_hw = max(_LANE, vmem_budget // (2 * row_bytes))
    hw_tile = _pick_lane_tile(HW, min(hw_tile_max, max_hw))

    n_r = _cdiv(R, r_tile)
    n_hw = _cdiv(HW, hw_tile)

    x_blk = _padded_block_bytes((r_tile, hw_tile), x2d.dtype)
    p_blk = _padded_block_bytes((r_tile, 1), jnp.float32)
    vmem_limit = min(int(2 * x_blk + 2 * p_blk + 8 * 2**20), 48 * 2**20)

    # NOTE: a partial last row block reads out-of-bounds rows; the garbage
    # only accumulates into pad rows (rows are independent) and is dropped
    # when the clipped output block is written back.
    return pl.pallas_call(
        _make_pool_mean_kernel(HW, hw_tile),
        out_shape=jax.ShapeDtypeStruct((R, 1), jnp.float32),
        grid_spec=pltpu.PrefetchScalarGridSpec(
            num_scalar_prefetch=0,
            grid=(n_r, n_hw),
            # TODO(synk): on v5e, sweep pipeline_mode=pl.Buffered(3) on the
            # input spec if a profile shows exposed DMA at small hw_tile.
            in_specs=[pl.BlockSpec((r_tile, hw_tile), lambda r, t: (r, t))],
            out_specs=pl.BlockSpec((r_tile, 1), lambda r, t: (r, 0)),
        ),
        compiler_params=pltpu.CompilerParams(
            dimension_semantics=("parallel", "arbitrary"),
            vmem_limit_bytes=vmem_limit,
        ),
    )(x2d)


# ----------------------------------------------------------------------------
# Stage 2: fused 1x1-conv + folded-BN + ReLU + spatial broadcast.
# ----------------------------------------------------------------------------
def _make_project_broadcast_kernel(out_dtype):
    def kernel(pooled_ref, w_ref, bias_ref, o_ref):
        # pooled_ref: (N, C_in) f32      (constant index_map -> VMEM-resident)
        # w_ref:      (C_in, C_out) f32  (BN scale already folded in)
        # bias_ref:   (1, C_out) f32
        # o_ref:      (N, C_out, hw_tile)
        z = jnp.dot(pooled_ref[...], w_ref[...],
                    preferred_element_type=jnp.float32)
        # Cast the tiny (N, C_out) tensor *before* broadcasting so the store
        # loop stays purely vst/DMA-bound.
        z = jnp.maximum(z + bias_ref[...], 0.0).astype(out_dtype)
        o_ref[...] = jnp.broadcast_to(z[:, :, None], o_ref.shape)

    return kernel


def _project_and_broadcast(pooled, w_scaled, bias, HW, out_dtype, *,
                           hw_tile_max=4096, vmem_budget=16 * 2**20):
    """(N, C_in) f32 -> relu(pooled @ w_scaled + bias) broadcast to (N, C_out, HW)."""
    N, C_in = pooled.shape
    C_out = w_scaled.shape[1]
    itemsize = jnp.dtype(out_dtype).itemsize

    row_bytes = N * _round_up(C_out, _sublane_multiple(out_dtype)) * itemsize
    max_hw = max(_LANE, vmem_budget // (2 * max(1, row_bytes)))
    hw_tile = _pick_lane_tile(HW, min(hw_tile_max, max_hw))
    if HW > _LANE:
        # Guarantee >= 2 spatial blocks so the "parallel" axis can be sharded
        # across both v7x TensorCores (no-op on v5e/v6e's single core).
        hw_tile = min(hw_tile, _round_up(_cdiv(HW, 2), _LANE))
    n_hw = _cdiv(HW, hw_tile)

    o_blk = _padded_block_bytes((N, C_out, hw_tile), out_dtype)
    small = (_padded_block_bytes((N, C_in), jnp.float32)
             + _padded_block_bytes((C_in, C_out), jnp.float32)
             + _padded_block_bytes((1, C_out), jnp.float32))
    vmem_limit = min(int(2 * o_blk + 2 * small + 8 * 2**20), 48 * 2**20)

    return pl.pallas_call(
        _make_project_broadcast_kernel(out_dtype),
        out_shape=jax.ShapeDtypeStruct((N, C_out, HW), out_dtype),
        grid_spec=pltpu.PrefetchScalarGridSpec(
            num_scalar_prefetch=0,
            grid=(n_hw,),
            in_specs=[pl.BlockSpec((N, C_in), lambda t: (0, 0)),
                      pl.BlockSpec((C_in, C_out), lambda t: (0, 0)),
                      pl.BlockSpec((1, C_out), lambda t: (0, 0))],
            out_specs=pl.BlockSpec((N, C_out, hw_tile), lambda t: (0, 0, t)),
        ),
        compiler_params=pltpu.CompilerParams(
            dimension_semantics=("parallel",),
            vmem_limit_bytes=vmem_limit,
        ),
    )(pooled, w_scaled, bias)


# ----------------------------------------------------------------------------
# Full forward pass.
# ----------------------------------------------------------------------------
def image_pool_forward(x, conv_w, bn_gamma, bn_beta, bn_mean, bn_var,
                       eps=1e-5, out_dtype=None,
                       pool_hw_tile_max=2048, bcast_hw_tile_max=4096):
    """x: (N, C_in, H, W) NCHW. Returns (N, C_out, H, W).

    Pass out_dtype=jnp.bfloat16 to halve the Stage-2 HBM write traffic when
    the consumer accepts bf16 (pool / conv / BN math stays f32 regardless).
    """
    N, C_in, H, W = x.shape
    C_out = conv_w.shape[0]
    HW = H * W
    out_dtype = x.dtype if out_dtype is None else out_dtype

    # Stage 1 (HBM-read bound): flattened (N*C_in, HW) mean pool.
    pooled = _global_avg_pool(x.reshape(N * C_in, HW),
                              hw_tile_max=pool_hw_tile_max)       # (N*C_in, 1)
    pooled = pooled.reshape(N, C_in)

    # Fold eval-mode BN into the 1x1-conv weight / bias (x-independent, tiny).
    scale = (bn_gamma / jnp.sqrt(bn_var + eps)).astype(jnp.float32)       # (C_out,)
    w_scaled = conv_w.reshape(C_out, C_in).T.astype(jnp.float32) * scale  # (C_in, C_out)
    bias = (bn_beta - bn_mean * scale).astype(jnp.float32).reshape(1, C_out)

    # Stage 2 (HBM-write bound): fused conv + BN + ReLU + broadcast (bilinear
    # resize of a 1x1 map is exactly a broadcast), lane-dense pipelined stores.
    out_flat = _project_and_broadcast(pooled, w_scaled, bias, HW, out_dtype,
                                      hw_tile_max=bcast_hw_tile_max)
    return out_flat.reshape(N, C_out, H, W)


# ----------------------------------------------------------------------------
# Reference + self-test.
# ----------------------------------------------------------------------------
def _reference(x, conv_w, bn_gamma, bn_beta, bn_mean, bn_var, eps=1e-5):
    N, C_in, H, W = x.shape
    C_out = conv_w.shape[0]
    pooled = jnp.mean(x, axis=(2, 3))                                  # (N, C_in)
    y = pooled @ conv_w.reshape(C_out, C_in).T                         # (N, C_out)
    scale = bn_gamma / jnp.sqrt(bn_var + eps)
    z = jnp.maximum(y * scale + (bn_beta - bn_mean * scale), 0.0)
    return jnp.broadcast_to(z[:, :, None, None], (N, C_out, H, W))


def _make_params(key, C_in, C_out):
    k_w, k_g, k_b, k_m, k_v = jax.random.split(key, 5)
    conv_w = jax.random.normal(k_w, (C_out, C_in, 1, 1), dtype=jnp.float32) * 0.1
    bn_gamma = 1.0 + 0.05 * jax.random.normal(k_g, (C_out,), dtype=jnp.float32)
    bn_beta = 0.05 * jax.random.normal(k_b, (C_out,), dtype=jnp.float32)
    bn_mean = 0.05 * jax.random.normal(k_m, (C_out,), dtype=jnp.float32)
    bn_var = jnp.abs(jax.random.normal(k_v, (C_out,), dtype=jnp.float32)) + 0.5
    return conv_w, bn_gamma, bn_beta, bn_mean, bn_var


if __name__ == "__main__":
    key = jax.random.PRNGKey(0)
    k_x, k_p = jax.random.split(key, 2)

    # Main config (small shapes consistent with the module).
    N, C_in, C_out, H, W = 2, 4, 8, 16, 16
    x = jax.random.normal(k_x, (N, C_in, H, W), dtype=jnp.float32)
    params = _make_params(k_p, C_in, C_out)

    out = image_pool_forward(x, *params)
    out = jax.block_until_ready(out)
    ref = _reference(x, *params)
    assert out.shape == (N, C_out, H, W)
    assert np.allclose(np.asarray(out), np.asarray(ref), atol=1e-5, rtol=1e-5)

    # Second config: forces small spatial tiles so the masked last HW tile,
    # partial row tiles (N*C_in = 10), and partial Stage-2 write-back blocks
    # are all exercised.
    key2 = jax.random.PRNGKey(1)
    k_x2, k_p2 = jax.random.split(key2, 2)
    N2, C2_in, C2_out, H2, W2 = 2, 5, 8, 20, 20
    x2 = jax.random.normal(k_x2, (N2, C2_in, H2, W2), dtype=jnp.float32)
    params2 = _make_params(k_p2, C2_in, C2_out)

    out2 = image_pool_forward(x2, *params2,
                              pool_hw_tile_max=128, bcast_hw_tile_max=128)
    out2 = jax.block_until_ready(out2)
    ref2 = _reference(x2, *params2)
    assert out2.shape == (N2, C2_out, H2, W2)
    assert np.allclose(np.asarray(out2), np.asarray(ref2), atol=1e-5, rtol=1e-5)

    print("KERNEL_OK")
</pallas_src>

<mosaic_0001>
module attributes {stable_mosaic.version = 11 : i64} {
  func.func @kernel(%arg0: i32, %arg1: i32, %arg2: memref<8x256xf32, #tpu.memory_space<vmem>>, %arg3: memref<8x1xf32, #tpu.memory_space<vmem>>) attributes {dimension_semantics = [#tpu.dimension_semantics<parallel>, #tpu.dimension_semantics<arbitrary>], iteration_bounds = array<i64: 1, 1>, scalar_prefetch = 0 : i64, scratch_operands = 0 : i64, tpu.core_type = #tpu.core_type<tc>, window_params = [{transform_indices = @transform_0, window_bounds = array<i64: 8, 256>}, {transform_indices = @transform_1, window_bounds = array<i64: 8, 1>}]} {
    %c0_i32 = arith.constant 0 : i32
    %0 = arith.cmpi eq, %arg1, %c0_i32 : i32
    %1 = arith.extui %0 : i1 to i32
    %c0_i32_0 = arith.constant 0 : i32
    %2 = arith.cmpi ne, %1, %c0_i32_0 : i32
    scf.if %2 {
      %cst_8 = arith.constant 0.000000e+00 : f32
      %12 = vector.broadcast %cst_8 : f32 to vector<8x1xf32>
      %c0_9 = arith.constant 0 : index
      %c0_10 = arith.constant 0 : index
      %13 = vector.load %arg3[%c0_9, %c0_10] : memref<8x1xf32, #tpu.memory_space<vmem>>, vector<8x1xf32>
      tpu.vector_store %arg3[%c0_9, %c0_10], %12 {strides = array<i32>} : memref<8x1xf32, #tpu.memory_space<vmem>>, vector<8x1xf32>,
    } else {
    }
    %c0 = arith.constant 0 : index
    %c0_1 = arith.constant 0 : index
    %3 = vector.load %arg2[%c0, %c0_1] : memref<8x256xf32, #tpu.memory_space<vmem>>, vector<8x256xf32>
    %c0_2 = arith.constant 0 : index
    %c0_3 = arith.constant 0 : index
    %4 = vector.load %arg3[%c0_2, %c0_3] : memref<8x1xf32, #tpu.memory_space<vmem>>, vector<8x1xf32>
    %cst = arith.constant dense<0.000000e+00> : vector<8xf32>
    %5 = vector.multi_reduction <add>, %3, %cst [1] : vector<8x256xf32> to vector<8xf32>
    %6 = vector.shape_cast %5 : vector<8xf32> to vector<8x1xf32>
    %7 = arith.addf %4, %6 : vector<8x1xf32>
    %c0_4 = arith.constant 0 : index
    %c0_5 = arith.constant 0 : index
    %8 = vector.load %arg3[%c0_4, %c0_5] : memref<8x1xf32, #tpu.memory_space<vmem>>, vector<8x1xf32>
    tpu.vector_store %arg3[%c0_4, %c0_5], %7 {strides = array<i32>} : memref<8x1xf32, #tpu.memory_space<vmem>>, vector<8x1xf32>,
    %c0_i32_6 = arith.constant 0 : i32
    %9 = arith.cmpi eq, %arg1, %c0_i32_6 : i32
    %10 = arith.extui %9 : i1 to i32
    %c0_i32_7 = arith.constant 0 : i32
    %11 = arith.cmpi ne, %10, %c0_i32_7 : i32
    scf.if %11 {
      %c0_8 = arith.constant 0 : index
      %c0_9 = arith.constant 0 : index
      %12 = vector.load %arg3[%c0_8, %c0_9] : memref<8x1xf32, #tpu.memory_space<vmem>>, vector<8x1xf32>
      %cst_10 = arith.constant 3.906250e-03 : f32
      %13 = vector.broadcast %cst_10 : f32 to vector<8x1xf32>
      %14 = arith.mulf %12, %13 : vector<8x1xf32>
      %c0_11 = arith.constant 0 : index
      %c0_12 = arith.constant 0 : index
      %15 = vector.load %arg3[%c0_11, %c0_12] : memref<8x1xf32, #tpu.memory_space<vmem>>, vector<8x1xf32>
      tpu.vector_store %arg3[%c0_11, %c0_12], %14 {strides = array<i32>} : memref<8x1xf32, #tpu.memory_space<vmem>>, vector<8x1xf32>,
    } else {
    }
    return
  }
  func.func @transform_0(%arg0: i32, %arg1: i32) -> (i32, i32) {
    %c0_i32 = arith.constant 0 : i32
    return %arg0, %arg1 : i32, i32
  }
  func.func @transform_1(%arg0: i32, %arg1: i32) -> (i32, i32) {
    %c0_i32 = arith.constant 0 : i32
    %c0_i32_0 = arith.constant 0 : i32
    return %arg0, %c0_i32 : i32, i32
  }
}

</mosaic_0001>

<bundles_post_ra>
// kernel: tpu_custom_call.1
= control target key start
LH: loop header
LB: loop body
LE: loop exit
PB: predicated region body
PF: predicated region fallthrough
CT: control target
= control target key end

     0   :  { %6 = vsyncpa [#allocation3], 0  ;;  %s72_s6 = smov [#allocation2]   ;;  %s111_s0 = inlined_call_operand.hbm [shape: f32[8,256], index: 0, kind: input, shape index: {}]   ;;  %s112_s1 = inlined_call_operand.vmem [shape: f32[8,1], index: 1, kind: output, shape index: {}]  }
   0x1   :  { %s13_s7 = sshll.u32 %s72_s6, 4  ;;  %s48_s10 = scalar_lea.hbm %s111_s0, 256  ;;  %s14_s7 = int_to_ptr.vmem [resolvable:$true] %s13_s7 }
   0x2   :  { %p49_p0 = scmp.ne.s32.totalorder %s111_s0, %s48_s10  ;;  %p52_p1 = scmp.lt.u32.totalorder %s48_s10, %s111_s0 }
   0x4   :  { %p54_p2 = pnand %p52_p1, %p49_p0 }
   0x6   :  { %57 = shalt.err (!%p54_p2)
}
   0x7   :  { %s58_s15 = scalar_lea.vmem %s14_s7, 256  ;;  %p63_p4 = scmp.lt.s32.totalorder %s14_s7, %s14_s7 }
   0x8   :  { %p59_p3 = scmp.ne.s32.totalorder %s14_s7, %s58_s15  ;;  %p64_p5 = scmp.lt.s32.totalorder %s58_s15, %s58_s15 }
   0xa   :  { %p65_p6 = por %p64_p5, %p63_p4 }
   0xc   :  { %p66_p7 = pnand %p65_p6, %p59_p3 }
   0xe   :  { %69 = shalt.err (!%p66_p7)
}
   0xf   :  { %16 = dma.hbm_to_vmem [thread:$0]  %s111_s0, 256, %s14_s7, [#allocation3]  }
  0x10   :  { %70 = dma.done.wait [#allocation3], 256  }
  0x11   :  { %71 = vsyncadd [#allocation3], 4294967040  ;;  %vm24_vm0 = vcmask 7168   ;;  %v73_v0 = vmov 0.0   ;;  %v26_v1 = vld [vmem:[#allocation2] sm:$0xff]  ;;  %v27_v2 = vld [vmem:[#allocation2 + $0x8] sm:$0xff] }
  0x12   :  { %25 = vst.msk [vmem:[%s112_s1] sm:$0xff] %vm24_vm0, %v73_v0  ;;  %v29_v3 = vadd.f32 %v27_v2, %v26_v1 }
  0x14   :  { %30 = vadd.xlane.f32.xlu0 %v29_v3 }
  0x19   :  { %v28_v4 = vld [vmem:[%s112_s1] sm:$0xff] }
  0xa1   :  { %v31_v5 = vpop.xlane.xlu0 %30 }
  0xa2   :  { %v32_v6 = vadd.f32 %v31_v5, %v28_v4 }
  0xa4   :  { %34 = vst.msk [vmem:[%s112_s1] sm:$0xff] %vm24_vm0, %v32_v6 }
  0xab   :  { %v38_v7 = vld [vmem:[%s112_s1] sm:$0xff] }
  0xac   :  { %v39_v8 = vmul.f32 0.00390625, %v38_v7 }
  0xae   :  { %40 = vst.msk [vmem:[%s112_s1] sm:$0xff] %vm24_vm0, %v39_v8 }
  0xaf   :  { %45 = vsyncpa [#allocation3], 1 }

</bundles_post_ra>
